<compile_context>
chip_gen: v5e
topology: v5e:2x2
jax: 0.10.0
libtpu: 0.0.40
codegen_flags: <defaults>
</compile_context>

<pallas_src>
import jax
import jax.numpy as jnp
from jax.experimental import pallas as pl
from jax.experimental.pallas import tpu as pltpu


def tap_kernel(x_ref, tproj_ref, w1l_ref, w2_ref, b2_ref, o_ref, h_ref):
    # x_ref:     (B, L)     bf16  language embedding (no S-fold row duplication)
    # tproj_ref: (S, H)     f32   temp_emb @ W1_temp + b1 (one row per segment)
    # w1l_ref:   (L, H)     bf16  first-linear weights acting on the language part
    # w2_ref:    (H, TN)    bf16  second-linear weight column tile
    # b2_ref:    (1, TN)    f32
    # o_ref:     (S*B, TN)  out   lane-dense output tile (s-major, b-minor rows)
    # h_ref:     (S*B, H)   bf16  VMEM scratch holding the hidden activation
    B = x_ref.shape[0]
    S, H = tproj_ref.shape

    # First layer on B rows only (f32 MXU accumulation).  Cheap enough to recompute per
    # column-tile step; see module docstring for why we avoid a pl.when(j == 0) hoist.
    xw1 = jnp.dot(x_ref[...], w1l_ref[...], preferred_element_type=jnp.float32)  # (B, H)

    for s in range(S):  # static unroll; S is small
        hs = jnp.maximum(xw1 + tproj_ref[s:s + 1, :], 0.0)                       # (B, H) f32
        h_ref[s * B:(s + 1) * B, :] = hs.astype(jnp.bfloat16)

    out = jnp.dot(h_ref[...], w2_ref[...], preferred_element_type=jnp.float32)   # (S*B, TN)
    o_ref[...] = (out + b2_ref[...]).astype(o_ref.dtype)


_VMEM_BUDGET = 32 * 1024 * 1024          # keep the working set v7x-safe (64 MiB physical)
_VMEM_LIMIT_BYTES = 48 * 1024 * 1024     # > v5e 16 MiB / v6e 32 MiB scoped defaults, < 64 MiB


def _pick_tn(md_pad):
    """Column tile for the (already 128-padded) output width."""
    if md_pad <= 128:
        return md_pad
    # Prefer 512/256/128 (v6e/v7x MXU is 2x256^2, so skip 384) and require >= 2 grid
    # steps so dimension_semantics=("parallel",) can shard the axis across v7x's two TCs.
    for tn in (512, 256, 128):
        if md_pad % tn == 0 and md_pad // tn >= 2:
            return tn
    return 128


def _vmem_bytes(B, L, S, H, tn, out_bytes=4):
    """Upper-bound VMEM working set (everything double-buffered)."""
    resident = B * L * 2 + S * H * 4 + L * H * 2 + S * B * H * 2   # x, tproj, W1_lang, h
    per_step = H * tn * 2 + tn * 4 + S * B * tn * out_bytes        # W2 tile, b2 tile, out tile
    return 2 * (resident + per_step)


def prepare_params(params, *, language_dim):
    """One-time parameter prep: fold b1/temporal projection, cast to bf16, pad columns."""
    L = language_dim
    w1 = params["w1"].astype(jnp.float32)                 # (L+T, H)
    b1 = params["b1"].astype(jnp.float32)                 # (H,)
    w2 = params["w2"].astype(jnp.float32)                 # (H, M*d)
    b2 = params["b2"].astype(jnp.float32)                 # (M*d,)
    temp = params["temp_emb"].astype(jnp.float32)         # (S, T)

    # [x | t_s] @ W1 + b1 == x @ W1[:L] + (t_s @ W1[L:] + b1)
    temp_proj = temp @ w1[L:] + b1[None, :]               # (S, H) f32

    md = w2.shape[1]
    md_pad = ((md + 127) // 128) * 128                    # lane-dense (unmasked vst) output
    if md_pad != md:
        w2 = jnp.pad(w2, ((0, 0), (0, md_pad - md)))
        b2 = jnp.pad(b2, (0, md_pad - md))

    return {
        "w1_lang": w1[:L].astype(jnp.bfloat16),           # (L, H)       bf16
        "temp_proj": temp_proj,                           # (S, H)       f32
        "w2": w2.astype(jnp.bfloat16),                    # (H, md_pad)  bf16
        "b2": b2.reshape(1, md_pad),                      # (1, md_pad)  f32
        "md": md,                                         # original output width
    }


def tap_forward_prepared(language_embedding, prepared, *, num_segments, prompt_length,
                         prompt_dim, out_dtype=jnp.float32):
    """Runs the kernel on prepared params; returns a (S, B, prompt_length, prompt_dim) slab."""
    x = language_embedding.astype(jnp.bfloat16)           # (B, L)
    B, L = x.shape
    tproj = prepared["temp_proj"]                         # (S, H)
    S, H = tproj.shape
    w1l = prepared["w1_lang"]                             # (L, H)
    w2 = prepared["w2"]                                   # (H, md_pad)
    b2 = prepared["b2"]                                   # (1, md_pad)
    md = prepared["md"]
    md_pad = w2.shape[1]
    assert S == num_segments and md == prompt_length * prompt_dim

    R = S * B
    out_bytes = jnp.dtype(out_dtype).itemsize

    tn = _pick_tn(md_pad)
    while tn > 128 and _vmem_bytes(B, L, S, H, tn, out_bytes) > _VMEM_BUDGET:
        tn //= 2
    grid = (md_pad // tn,)

    cost = pl.CostEstimate(
        flops=int(2 * B * L * H * grid[0] + 2 * R * H * md_pad),
        transcendentals=0,
        bytes_accessed=int(B * L * 2 + S * H * 4 + L * H * 2
                           + H * md_pad * 2 + md_pad * 4 + R * md_pad * out_bytes),
    )

    out = pl.pallas_call(
        tap_kernel,
        out_shape=jax.ShapeDtypeStruct((R, md_pad), out_dtype),
        grid_spec=pltpu.PrefetchScalarGridSpec(
            num_scalar_prefetch=0,
            grid=grid,
            in_specs=[
                pl.BlockSpec((B, L), lambda j: (0, 0)),    # language rows (resident)
                pl.BlockSpec((S, H), lambda j: (0, 0)),    # temporal projection (resident)
                pl.BlockSpec((L, H), lambda j: (0, 0)),    # W1 language part (resident)
                pl.BlockSpec((H, tn), lambda j: (0, j)),   # W2 column tile (streamed)
                pl.BlockSpec((1, tn), lambda j: (0, j)),   # b2 column tile
            ],
            out_specs=pl.BlockSpec((R, tn), lambda j: (0, j)),
            scratch_shapes=[pltpu.VMEM((R, H), jnp.bfloat16)],
        ),
        compiler_params=pltpu.CompilerParams(
            dimension_semantics=("parallel",),
            vmem_limit_bytes=_VMEM_LIMIT_BYTES,
        ),
        cost_estimate=cost,
    )(x, tproj, w1l, w2, b2)

    if md_pad != md:
        out = out[:, :md]
    return out.reshape(S, B, prompt_length, prompt_dim)


def tap_forward(language_embedding, params, *, num_segments, prompt_length, prompt_dim,
                out_dtype=jnp.float32):
    """Convenience wrapper over raw params (prefer hoisting prepare_params at the call site)."""
    prepared = prepare_params(params, language_dim=language_embedding.shape[1])
    return tap_forward_prepared(language_embedding, prepared, num_segments=num_segments,
                                prompt_length=prompt_length, prompt_dim=prompt_dim,
                                out_dtype=out_dtype)


def tap_forward_prompts(language_embedding, params, *, num_segments, prompt_length,
                        prompt_dim):
    """API-parity helper mirroring the PyTorch module's list-of-prompts return."""
    slab = tap_forward(language_embedding, params, num_segments=num_segments,
                       prompt_length=prompt_length, prompt_dim=prompt_dim)
    return [slab[s] for s in range(num_segments)]


def tap_forward_ref(language_embedding, params, *, num_segments, prompt_length, prompt_dim):
    """Pure-JAX f32 reference mirroring the PyTorch forward; returns (S, B, M, d)."""
    x = language_embedding.astype(jnp.float32)
    B = x.shape[0]
    prompts = []
    for s in range(num_segments):
        temp_emb = jnp.broadcast_to(params["temp_emb"][s], (B, params["temp_emb"].shape[1]))
        combined = jnp.concatenate([x, temp_emb], axis=-1)
        h = jnp.maximum(combined @ params["w1"] + params["b1"], 0.0)
        p = h @ params["w2"] + params["b2"]
        prompts.append(p.reshape(B, prompt_length, prompt_dim))
    return jnp.stack(prompts, axis=0)


def init_params(key, *, num_segments, prompt_dim, language_dim, temp_emb_dim, hidden_dim,
                prompt_length):
    """Deterministic synthetic parameters matching the PyTorch module's shapes."""
    k0, k1, k2, k3, k4 = jax.random.split(key, 5)
    in_dim = language_dim + temp_emb_dim
    out_dim = prompt_length * prompt_dim
    return {
        "temp_emb": jax.random.normal(k0, (num_segments, temp_emb_dim), jnp.float32),
        "w1": jax.random.normal(k1, (in_dim, hidden_dim), jnp.float32) * 0.1,
        "b1": jax.random.normal(k2, (hidden_dim,), jnp.float32) * 0.1,
        "w2": jax.random.normal(k3, (hidden_dim, out_dim), jnp.float32) * 0.1,
        "b2": jax.random.normal(k4, (out_dim,), jnp.float32) * 0.1,
    }


if __name__ == "__main__":
    num_segments = 4
    prompt_dim = 16
    language_dim = 32
    temp_emb_dim = 8
    hidden_dim = 32
    prompt_length = 8
    batch = 2

    key = jax.random.PRNGKey(0)
    kx, kp, kp2 = jax.random.split(key, 3)
    language_embedding = jax.random.normal(kx, (batch, language_dim), jnp.float32)
    params = init_params(kp, num_segments=num_segments, prompt_dim=prompt_dim,
                         language_dim=language_dim, temp_emb_dim=temp_emb_dim,
                         hidden_dim=hidden_dim, prompt_length=prompt_length)

    # One-time weight prep (casts / folding / padding), then the kernel call.
    prepared = prepare_params(params, language_dim=language_dim)
    slab = tap_forward_prepared(language_embedding, prepared, num_segments=num_segments,
                                prompt_length=prompt_length, prompt_dim=prompt_dim)
    slab = jax.block_until_ready(slab)
    assert slab.shape == (num_segments, batch, prompt_length, prompt_dim)

    ref = tap_forward_ref(language_embedding, params, num_segments=num_segments,
                          prompt_length=prompt_length, prompt_dim=prompt_dim)
    # bf16 MXU operands (f32 accumulation) => loosened f32 tolerance.
    assert jnp.allclose(slab, ref, atol=3e-2, rtol=3e-2), \
        f"max abs err {jnp.max(jnp.abs(slab - ref))}"

    prompts = tap_forward_prompts(language_embedding, params, num_segments=num_segments,
                                  prompt_length=prompt_length, prompt_dim=prompt_dim)
    assert len(prompts) == num_segments
    assert all(p.shape == (batch, prompt_length, prompt_dim) for p in prompts)

    # Exercise the column-padding path (M*d = 80 -> padded to 128, pad sliced off).
    prompt_length2 = 5
    params2 = init_params(kp2, num_segments=num_segments, prompt_dim=prompt_dim,
                          language_dim=language_dim, temp_emb_dim=temp_emb_dim,
                          hidden_dim=hidden_dim, prompt_length=prompt_length2)
    slab2 = tap_forward(language_embedding, params2, num_segments=num_segments,
                        prompt_length=prompt_length2, prompt_dim=prompt_dim)
    slab2 = jax.block_until_ready(slab2)
    ref2 = tap_forward_ref(language_embedding, params2, num_segments=num_segments,
                           prompt_length=prompt_length2, prompt_dim=prompt_dim)
    assert slab2.shape == (num_segments, batch, prompt_length2, prompt_dim)
    assert jnp.allclose(slab2, ref2, atol=3e-2, rtol=3e-2), \
        f"max abs err {jnp.max(jnp.abs(slab2 - ref2))}"

    print("KERNEL_OK")
</pallas_src>

<mosaic_0001>
module attributes {stable_mosaic.version = 11 : i64} {
  func.func @tap_kernel(%arg0: i32, %arg1: memref<2x32xbf16, #tpu.memory_space<vmem>>, %arg2: memref<4x32xf32, #tpu.memory_space<vmem>>, %arg3: memref<32x32xbf16, #tpu.memory_space<vmem>>, %arg4: memref<32x128xbf16, #tpu.memory_space<vmem>>, %arg5: memref<1x128xf32, #tpu.memory_space<vmem>>, %arg6: memref<8x128xf32, #tpu.memory_space<vmem>>, %arg7: memref<8x32xbf16, #tpu.memory_space<vmem>>) attributes {dimension_semantics = [#tpu.dimension_semantics<parallel>], iteration_bounds = array<i64: 1>, scalar_prefetch = 0 : i64, scratch_operands = 1 : i64, tpu.core_type = #tpu.core_type<tc>, window_params = [{pipeline_mode = #tpu.pipeline_mode<synchronous>, transform_indices = @transform_0, window_bounds = array<i64: 2, 32>}, {pipeline_mode = #tpu.pipeline_mode<synchronous>, transform_indices = @transform_1, window_bounds = array<i64: 4, 32>}, {pipeline_mode = #tpu.pipeline_mode<synchronous>, transform_indices = @transform_2, window_bounds = array<i64: 32, 32>}, {transform_indices = @transform_3, window_bounds = array<i64: 32, 128>}, {transform_indices = @transform_4, window_bounds = array<i64: 1, 128>}, {transform_indices = @transform_5, window_bounds = array<i64: 8, 128>}]} {
    %c0 = arith.constant 0 : index
    %c0_0 = arith.constant 0 : index
    %0 = vector.load %arg1[%c0, %c0_0] : memref<2x32xbf16, #tpu.memory_space<vmem>>, vector<2x32xbf16>
    %c0_1 = arith.constant 0 : index
    %c0_2 = arith.constant 0 : index
    %1 = vector.load %arg3[%c0_1, %c0_2] : memref<32x32xbf16, #tpu.memory_space<vmem>>, vector<32x32xbf16>
    %cst = arith.constant dense<0.000000e+00> : vector<2x32xf32>
    %2 = tpu.matmul %0, %1, %cst {dimension_numbers = #tpu.dot_dimension_numbers<[1], [0], [0], [1], [0, 0, 1, 1], [], []>} : vector<2x32xbf16>, vector<32x32xbf16>, vector<2x32xf32> -> vector<2x32xf32>
    %c0_3 = arith.constant 0 : index
    %c0_4 = arith.constant 0 : index
    %3 = vector.load %arg2[%c0_3, %c0_4] : memref<4x32xf32, #tpu.memory_space<vmem>>, vector<1x32xf32>
    %4 = vector.broadcast %3 : vector<1x32xf32> to vector<2x32xf32>
    %5 = arith.addf %2, %4 : vector<2x32xf32>
    %cst_5 = arith.constant 0.000000e+00 : f32
    %6 = vector.broadcast %cst_5 : f32 to vector<2x32xf32>
    %7 = arith.maximumf %5, %6 : vector<2x32xf32>
    %8 = arith.truncf %7 : vector<2x32xf32> to vector<2x32xbf16>
    %c0_6 = arith.constant 0 : index
    %c0_7 = arith.constant 0 : index
    %9 = vector.load %arg7[%c0_6, %c0_7] : memref<8x32xbf16, #tpu.memory_space<vmem>>, vector<2x32xbf16>
    tpu.vector_store %arg7[%c0_6, %c0_7], %8 {strides = array<i32>} : memref<8x32xbf16, #tpu.memory_space<vmem>>, vector<2x32xbf16>,
    %c1 = arith.constant 1 : index
    %c0_8 = arith.constant 0 : index
    %10 = vector.load %arg2[%c1, %c0_8] : memref<4x32xf32, #tpu.memory_space<vmem>>, vector<1x32xf32>
    %11 = vector.broadcast %10 : vector<1x32xf32> to vector<2x32xf32>
    %12 = arith.addf %2, %11 : vector<2x32xf32>
    %cst_9 = arith.constant 0.000000e+00 : f32
    %13 = vector.broadcast %cst_9 : f32 to vector<2x32xf32>
    %14 = arith.maximumf %12, %13 : vector<2x32xf32>
    %15 = arith.truncf %14 : vector<2x32xf32> to vector<2x32xbf16>
    %c2 = arith.constant 2 : index
    %c0_10 = arith.constant 0 : index
    %16 = vector.load %arg7[%c2, %c0_10] : memref<8x32xbf16, #tpu.memory_space<vmem>>, vector<2x32xbf16>
    tpu.vector_store %arg7[%c2, %c0_10], %15 {strides = array<i32>} : memref<8x32xbf16, #tpu.memory_space<vmem>>, vector<2x32xbf16>,
    %c2_11 = arith.constant 2 : index
    %c0_12 = arith.constant 0 : index
    %17 = vector.load %arg2[%c2_11, %c0_12] : memref<4x32xf32, #tpu.memory_space<vmem>>, vector<1x32xf32>
    %18 = vector.broadcast %17 : vector<1x32xf32> to vector<2x32xf32>
    %19 = arith.addf %2, %18 : vector<2x32xf32>
    %cst_13 = arith.constant 0.000000e+00 : f32
    %20 = vector.broadcast %cst_13 : f32 to vector<2x32xf32>
    %21 = arith.maximumf %19, %20 : vector<2x32xf32>
    %22 = arith.truncf %21 : vector<2x32xf32> to vector<2x32xbf16>
    %c4 = arith.constant 4 : index
    %c0_14 = arith.constant 0 : index
    %23 = vector.load %arg7[%c4, %c0_14] : memref<8x32xbf16, #tpu.memory_space<vmem>>, vector<2x32xbf16>
    tpu.vector_store %arg7[%c4, %c0_14], %22 {strides = array<i32>} : memref<8x32xbf16, #tpu.memory_space<vmem>>, vector<2x32xbf16>,
    %c3 = arith.constant 3 : index
    %c0_15 = arith.constant 0 : index
    %24 = vector.load %arg2[%c3, %c0_15] : memref<4x32xf32, #tpu.memory_space<vmem>>, vector<1x32xf32>
    %25 = vector.broadcast %24 : vector<1x32xf32> to vector<2x32xf32>
    %26 = arith.addf %2, %25 : vector<2x32xf32>
    %cst_16 = arith.constant 0.000000e+00 : f32
    %27 = vector.broadcast %cst_16 : f32 to vector<2x32xf32>
    %28 = arith.maximumf %26, %27 : vector<2x32xf32>
    %29 = arith.truncf %28 : vector<2x32xf32> to vector<2x32xbf16>
    %c6 = arith.constant 6 : index
    %c0_17 = arith.constant 0 : index
    %30 = vector.load %arg7[%c6, %c0_17] : memref<8x32xbf16, #tpu.memory_space<vmem>>, vector<2x32xbf16>
    tpu.vector_store %arg7[%c6, %c0_17], %29 {strides = array<i32>} : memref<8x32xbf16, #tpu.memory_space<vmem>>, vector<2x32xbf16>,
    %c0_18 = arith.constant 0 : index
    %c0_19 = arith.constant 0 : index
    %31 = vector.load %arg7[%c0_18, %c0_19] : memref<8x32xbf16, #tpu.memory_space<vmem>>, vector<8x32xbf16>
    %c0_20 = arith.constant 0 : index
    %c0_21 = arith.constant 0 : index
    %32 = vector.load %arg4[%c0_20, %c0_21] : memref<32x128xbf16, #tpu.memory_space<vmem>>, vector<32x128xbf16>
    %cst_22 = arith.constant dense<0.000000e+00> : vector<8x128xf32>
    %33 = tpu.matmul %31, %32, %cst_22 {dimension_numbers = #tpu.dot_dimension_numbers<[1], [0], [0], [1], [0, 0, 1, 1], [], []>} : vector<8x32xbf16>, vector<32x128xbf16>, vector<8x128xf32> -> vector<8x128xf32>
    %c0_23 = arith.constant 0 : index
    %c0_24 = arith.constant 0 : index
    %34 = vector.load %arg5[%c0_23, %c0_24] : memref<1x128xf32, #tpu.memory_space<vmem>>, vector<1x128xf32>
    %35 = vector.broadcast %34 : vector<1x128xf32> to vector<8x128xf32>
    %36 = arith.addf %33, %35 : vector<8x128xf32>
    %c0_25 = arith.constant 0 : index
    %c0_26 = arith.constant 0 : index
    %37 = vector.load %arg6[%c0_25, %c0_26] : memref<8x128xf32, #tpu.memory_space<vmem>>, vector<8x128xf32>
    tpu.vector_store %arg6[%c0_25, %c0_26], %36 {strides = array<i32>} : memref<8x128xf32, #tpu.memory_space<vmem>>, vector<8x128xf32>,
    return
  }
  func.func @transform_0(%arg0: i32) -> (i32, i32) {
    %c0_i32 = arith.constant 0 : i32
    %c0_i32_0 = arith.constant 0 : i32
    %c0_i32_1 = arith.constant 0 : i32
    return %c0_i32, %c0_i32_0 : i32, i32
  }
  func.func @transform_1(%arg0: i32) -> (i32, i32) {
    %c0_i32 = arith.constant 0 : i32
    %c0_i32_0 = arith.constant 0 : i32
    %c0_i32_1 = arith.constant 0 : i32
    return %c0_i32, %c0_i32_0 : i32, i32
  }
  func.func @transform_2(%arg0: i32) -> (i32, i32) {
    %c0_i32 = arith.constant 0 : i32
    %c0_i32_0 = arith.constant 0 : i32
    %c0_i32_1 = arith.constant 0 : i32
    return %c0_i32, %c0_i32_0 : i32, i32
  }
  func.func @transform_3(%arg0: i32) -> (i32, i32) {
    %c0_i32 = arith.constant 0 : i32
    %c0_i32_0 = arith.constant 0 : i32
    return %c0_i32, %arg0 : i32, i32
  }
  func.func @transform_4(%arg0: i32) -> (i32, i32) {
    %c0_i32 = arith.constant 0 : i32
    %c0_i32_0 = arith.constant 0 : i32
    return %c0_i32, %arg0 : i32, i32
  }
  func.func @transform_5(%arg0: i32) -> (i32, i32) {
    %c0_i32 = arith.constant 0 : i32
    %c0_i32_0 = arith.constant 0 : i32
    return %c0_i32, %arg0 : i32, i32
  }
}

</mosaic_0001>

<bundles_post_ra>
// kernel: tpu_custom_call.1
= control target key start
LH: loop header
LB: loop body
LE: loop exit
PB: predicated region body
PF: predicated region fallthrough
CT: control target
= control target key end

     0   :  { %10 = vsyncpa [#allocation4], 0  ;;  %s428_s0 = inlined_call_operand.hbm [shape: bf16[2,32], index: 0, kind: input, shape index: {}]   ;;  %s429_s1 = inlined_call_operand.hbm [shape: f32[4,32], index: 1, kind: input, shape index: {}]   ;;  %s430_s2 = inlined_call_operand.hbm [shape: bf16[32,32], index: 2, kind: input, shape index: {}]   ;;  %s431_s3 = inlined_call_operand.hbm [shape: bf16[32,128], index: 3, kind: input, shape index: {}]   ;;  %s432_s4 = inlined_call_operand.vmem [shape: f32[1,128], index: 4, kind: input, shape index: {}]   ;;  %s433_s5 = inlined_call_operand.hbm [shape: f32[8,128], index: 5, kind: output, shape index: {}]  }
   0x1   :  { %11 = vsyncpa [#allocation7], 0 }
   0x2   :  { %12 = vsyncpa [#allocation10], 0  ;;  %s30_s20 = sshll.u32 %s429_s1, 4  ;;  %s31_s20 = int_to_ptr.hbm [resolvable:$true] %s30_s20 }
   0x3   :  { %13 = vsyncpa [#allocation5], 0  ;;  %s371_s21 = smov [#allocation6]   ;;  %s19_s25 = sshll.u32 %s428_s0, 4  ;;  %s20_s25 = int_to_ptr.hbm [resolvable:$true] %s19_s25 }
   0x4   :  { %s32_s22 = sshll.u32 %s371_s21, 4  ;;  %s372_s26 = smov [#allocation3]   ;;  %s33_s22 = int_to_ptr.vmem [resolvable:$true] %s32_s22 }
   0x5   :  { %35 = dma.hbm_to_vmem [thread:$0]  %s31_s20, 64, %s33_s22, [#allocation7]  }
   0x6   :  { %s21_s27 = sshll.u32 %s372_s26, 4  ;;  %s40_s30 = sshll.u32 %s430_s2, 4  ;;  %s22_s27 = int_to_ptr.vmem [resolvable:$true] %s21_s27  ;;  %s41_s30 = int_to_ptr.hbm [resolvable:$true] %s40_s30 }
   0x7   :  { %24 = dma.hbm_to_vmem [thread:$0]  %s20_s25, 16, %s22_s27, [#allocation4]  }
   0x8   :  { %s373_s1 = smov [#allocation8]   ;;  %s53_s9 = sshll.u32 %s431_s3, 4  ;;  %s54_s9 = int_to_ptr.hbm [resolvable:$true] %s53_s9 }
   0x9   :  { %s42_s6 = sshll.u32 %s373_s1, 4  ;;  %s374_s10 = smov 64   ;;  %s43_s6 = int_to_ptr.vmem [resolvable:$true] %s42_s6 }
   0xa   :  { %s375_s0 = smov 4   ;;  %s376_s11 = smov [#allocation9]  }
   0xb   :  { %48 = dma.hbm_to_vmem [thread:$0]  %s41_s30, 256, %s43_s6, [#allocation7], %s374_s10, %s374_s10, %s375_s0  }
   0xc   :  { %s55_s12 = sshll.u32 %s376_s11, 4  ;;  %s56_s12 = int_to_ptr.vmem [resolvable:$true] %s55_s12 }
   0xd   :  { %61 = dma.hbm_to_vmem [thread:$0]  %s54_s9, 256, %s56_s12, [#allocation10], %s374_s10, %s374_s10, %s375_s0  }
   0xe   :  { %363 = dma.done.wait [#allocation4], 16  }
   0xf   :  { %364 = vsyncadd [#allocation4], 4294967280 }
  0x10   :  { %365 = dma.done.wait [#allocation7], 320  }
  0x11   :  { %366 = vsyncadd [#allocation7], 4294966976 }
  0x12   :  { %367 = dma.done.wait [#allocation10], 256  }
  0x13   :  { %368 = vsyncadd [#allocation10], 4294967040  ;;  %v228_v0 = vld [vmem:[#allocation8 + $0x8] sm:$0xff]  ;;  %v227_v1 = vld [vmem:[#allocation8] sm:$0xff]  ;;  %vm98_vm0 = vcmask 261120   ;;  %vm120_vm1 = vcmask 253952  }
  0x14   :  { %108 = vmatpush.bf16.msra.mxu0 %v228_v0  ;;  %v81_v2 = vld [vmem:[#allocation3] sm:$0x1]  ;;  %v229_v4 = vld [vmem:[#allocation9] sm:$0xff]  ;;  %v238_v5 = vld [vmem:[#allocation6] ss:$0 sm:$0xff]  ;;  %vm130_vm2 = vcmask 254977  }
  0x15   :  { %v230_v3 = vld [vmem:[#allocation9 + $0x8] sm:$0xff]  ;;  %vm140_vm3 = vcmask 256002   ;;  %vm150_vm4 = vcmask 257027   ;;  %v242_v27 = vld [vmem:[%s432_s4] ss:$0 sm:$0xff]  ;;  %s377_s13 = smov [#allocation11]  }
  0x16   :  { %182 = vmatpush.bf16.msra.mxu1 %v230_v3  ;;  %v239_v6 = vld [vmem:[#allocation6 + $0x1] ss:$0 sm:$0xff]  ;;  %v240_v7 = vld [vmem:[#allocation6 + $0x2] ss:$0 sm:$0xff]  ;;  %v241_v8 = vld [vmem:[#allocation6 + $0x3] ss:$0 sm:$0xff] }
  0x17   :  { %s195_s14 = sshll.u32 %s377_s13, 4  ;;  %s197_s17 = sshll.u32 %s433_s5, 4  ;;  %s196_s14 = int_to_ptr.vmem [resolvable:$true] %s195_s14  ;;  %s198_s17 = int_to_ptr.hbm [resolvable:$true] %s197_s17 }
  0x18   :  { %109 = vmatpush.bf16.msra.mxu0 %v227_v1 }
  0x1a   :  { %183 = vmatpush.bf16.msra.mxu1 %v229_v4 }
  0x1b   :  { %217 = vmatmul.msk.bf16.vlgmr.msra.gmra.mxu0 %vm98_vm0, %v81_v2 }
  0x98   :  { %v111_v9 = vpop.f32.mrf.mxu0 }
  0x99   :  { %v117_v10 = vadd.f32 %v238_v5, %v111_v9  ;;  %v124_v11 = vadd.f32 %v239_v6, %v111_v9  ;;  %v134_v12 = vadd.f32 %v240_v7, %v111_v9  ;;  %v144_v13 = vadd.f32 %v241_v8, %v111_v9 }
  0x9b   :  { %v118_v14 = vmax.f32 %v117_v10, 0.0  ;;  %v125_v15 = vmax.f32 %v124_v11, 0.0  ;;  %v135_v16 = vmax.f32 %v134_v12, 0.0  ;;  %v145_v17 = vmax.f32 %v144_v13, 0.0 }
  0x9d   :  { %v119_v18 = vpack.c.bf16 %v118_v14, %v118_v14  ;;  %v126_v19 = vpack.c.bf16 %v125_v15, %v125_v15  ;;  %v136_v20 = vpack.c.bf16 %v135_v16, %v135_v16  ;;  %v146_v21 = vpack.c.bf16 %v145_v17, %v145_v17 }
  0x9f   :  { %121 = vst.msk [vmem:[#allocation2] sm:$0x1] %vm120_vm1, %v119_v18  ;;  %v128_v22 = vrot.slane %v126_v19, 7  ;;  %v138_v23 = vrot.slane %v136_v20, 6  ;;  %v148_v24 = vrot.slane %v146_v21, 5 }
  0xa0   :  { %v113_v25 = vpop.f32.mrf.mxu0 }
  0xa1   :  { %131 = vst.msk [vmem:[#allocation2] sm:$0x2] %vm130_vm2, %v128_v22 }
  0xa2   :  { %141 = vst.msk [vmem:[#allocation2] sm:$0x4] %vm140_vm3, %v138_v23 }
  0xa3   :  { %151 = vst.msk [vmem:[#allocation2] sm:$0x8] %vm150_vm4, %v148_v24 }
  0xaa   :  { %v152_v26 = vld [vmem:[#allocation2] sm:$0xf] }
  0xab   :  { %226 = vmatmul.msk.bf16.vlgmr.msra.gmra.mxu1 %vm98_vm0, %v152_v26 }
 0x128   :  { %v185_v28 = vpop.f32.mrf.mxu1 }
 0x129   :  { %v186_v29 = vadd.f32 %v242_v27, %v185_v28 }
 0x12b   :  { %189 = vst [vmem:[#allocation11] sm:$0xff] %v186_v29 }
 0x12c   :  { %200 = dma.vmem_to_hbm [thread:$0]  %s196_s14, 128, %s198_s17, [#allocation5]  }
 0x130   :  { %v187_v30 = vpop.f32.mrf.mxu1 }
 0x131   :  { %369 = dma.done.wait [#allocation5], 128  }
 0x132   :  { %370 = vsyncadd [#allocation5], 4294967168 }
 0x133   :  { %205 = vsyncpa [#allocation4], 1 }
 0x134   :  { %206 = vsyncpa [#allocation7], 1 }
 0x135   :  { %207 = vsyncpa [#allocation10], 1 }
 0x136   :  { %208 = vsyncpa [#allocation5], 1 }

</bundles_post_ra>
